<compile_context>
chip_gen: v7x
topology: tpu7x:2x2x1
jax: 0.10.0
libtpu: 0.0.40
codegen_flags: <defaults>
</compile_context>

<pallas_src>
import numpy as np
import jax
import jax.numpy as jnp
from jax.experimental import pallas as pl
from jax.experimental.pallas import tpu as pltpu


# ----------------------------- small helpers ------------------------------

def _row_tile(n, cap=512):
    """Largest divisor of n that is a multiple of 8 and <= cap, else n (full)."""
    for t in range(min(n, cap), 7, -1):
        if n % t == 0 and t % 8 == 0:
            return t
    return n


def _images_per_block(n_imgs, rows_per_img, cap_rows=128):
    """Images-per-block m with m | n_imgs and (m*rows_per_img) % 8 == 0."""
    cap = max(1, cap_rows // max(rows_per_img, 1))
    for m in range(min(n_imgs, cap), 0, -1):
        if n_imgs % m == 0 and (m * rows_per_img) % 8 == 0:
            return m
    return n_imgs


# ------------------------ fused GEMM (conv) kernels ------------------------

def _gemm_bias_kernel(a_ref, b_ref, bias_ref, o_ref):
    acc = jnp.dot(a_ref[...], b_ref[...].astype(jnp.bfloat16),
                  preferred_element_type=jnp.float32)
    o_ref[...] = acc + bias_ref[...]


def _gemm_bias_res_kernel(a_ref, b_ref, bias_ref, res_ref, o_ref):
    acc = jnp.dot(a_ref[...], b_ref[...].astype(jnp.bfloat16),
                  preferred_element_type=jnp.float32)
    o_ref[...] = acc + bias_ref[...] + res_ref[...]


def matmul_bias(a, b, bias, res=None):
    """out(Cout, M) = a(Cout, K) @ b(K, M) + bias + (optional) res.

    a: bf16 weights; b: f32 or bf16 columns (cast to bf16 in-kernel);
    accumulation / epilogue in f32.  M (large) is the lane axis, tiled by 512.
    """
    cout, K = a.shape
    _, M = b.shape
    tn = 512 if M >= 1024 else M
    grid_n = pl.cdiv(M, tn)

    in_specs = [pl.BlockSpec((cout, K), lambda i: (0, 0)),
                pl.BlockSpec((K, tn), lambda i: (0, i)),
                pl.BlockSpec((cout, 1), lambda i: (0, 0))]
    args = [a, b, bias.reshape(cout, 1)]
    if res is None:
        kernel = _gemm_bias_kernel
    else:
        kernel = _gemm_bias_res_kernel
        in_specs.append(pl.BlockSpec((cout, tn), lambda i: (0, i)))
        args.append(res)

    return pl.pallas_call(
        kernel,
        out_shape=jax.ShapeDtypeStruct((cout, M), jnp.float32),
        grid=(grid_n,),
        in_specs=in_specs,
        out_specs=pl.BlockSpec((cout, tn), lambda i: (0, i)),
        compiler_params=pltpu.CompilerParams(dimension_semantics=("parallel",)),
    )(*args)


def conv2d(x, p, k=1, stride=1, pad=0, res=None):
    """Conv2d in CNHW layout.  x: (Cin, N, H, W).  p["w"]: (Cout, k*k*Cin) bf16
    with K ordered (ky, kx, cin).  Optional fused residual add (CNHW)."""
    cin, N, H, W = x.shape
    cout = p["w"].shape[0]
    Ho = (H + 2 * pad - k) // stride + 1
    Wo = (W + 2 * pad - k) // stride + 1
    M = N * Ho * Wo
    if k == 1 and stride == 1 and pad == 0:
        cols = x.reshape(cin, M)                       # free reshape, cast in kernel
    else:
        xb = x.astype(jnp.bfloat16)
        xp = jnp.pad(xb, ((0, 0), (0, 0), (pad, pad), (pad, pad))) if pad else xb
        taps = []
        for ky in range(k):
            for kx in range(k):
                t = xp[:, :, ky:ky + stride * Ho:stride, kx:kx + stride * Wo:stride]
                taps.append(t.reshape(cin, M))
        cols = jnp.concatenate(taps, axis=0)           # (k*k*cin, M) bf16
    res_flat = None if res is None else res.reshape(cout, M)
    out = matmul_bias(p["w"], cols, p["b"], res=res_flat)
    return out.reshape(cout, N, Ho, Wo)


# -------------------------- GroupNorm + ReLU kernel ------------------------

def _gn_relu_kernel(x_ref, g_ref, b_ref, o_ref):
    x = x_ref[...]                                    # (1, Cg, N, H*W) f32
    cnt = x.shape[1] * x.shape[3]
    s1 = jnp.sum(jnp.sum(x, axis=3, keepdims=True), axis=1, keepdims=True)
    s2 = jnp.sum(jnp.sum(x * x, axis=3, keepdims=True), axis=1, keepdims=True)
    mean = s1 * (1.0 / cnt)
    var = jnp.maximum(s2 * (1.0 / cnt) - mean * mean, 0.0)
    inv = jax.lax.rsqrt(var + 1e-5)                   # (1, 1, N, 1)
    scale = g_ref[...] * inv                          # (1, Cg, N, 1)
    shift = b_ref[...] - mean * scale
    o_ref[...] = jnp.maximum(x * scale + shift, 0.0).astype(o_ref.dtype)


def groupnorm_relu(x, gn, groups=4, out_dtype=jnp.float32):
    """nn.GroupNorm(groups, C) + ReLU (always fused in this net), CNHW input."""
    C, N, H, W = x.shape
    Cg = C // groups
    xr = x.reshape(groups, Cg, N, H * W)
    g = gn["g"].reshape(groups, Cg, 1, 1)
    b = gn["b"].reshape(groups, Cg, 1, 1)
    out = pl.pallas_call(
        _gn_relu_kernel,
        out_shape=jax.ShapeDtypeStruct(xr.shape, out_dtype),
        grid=(groups,),
        in_specs=[pl.BlockSpec((1, Cg, N, H * W), lambda i: (i, 0, 0, 0)),
                  pl.BlockSpec((1, Cg, 1, 1), lambda i: (i, 0, 0, 0)),
                  pl.BlockSpec((1, Cg, 1, 1), lambda i: (i, 0, 0, 0))],
        out_specs=pl.BlockSpec((1, Cg, N, H * W), lambda i: (i, 0, 0, 0)),
        compiler_params=pltpu.CompilerParams(dimension_semantics=("parallel",)),
    )(xr, g, b)
    return out.reshape(C, N, H, W)


# ------------------------------- 2x2 max-pool ------------------------------

def _maxpool_kernel(x_ref, o_ref):
    W = o_ref.shape[1]
    r = jnp.maximum(x_ref[:, :W], x_ref[:, W:])            # vertical pair max
    rn = jnp.concatenate([r[:, 1:], r[:, :1]], axis=1)     # right neighbour
    o_ref[...] = jnp.maximum(r, rn)                        # valid at even lanes


def maxpool2x2(x):
    C, N, H, W = x.shape
    R = C * N * (H // 2)
    xr = x.reshape(R, 2 * W)                               # adjacent row pairs
    tr = _row_tile(R)
    out = pl.pallas_call(
        _maxpool_kernel,
        out_shape=jax.ShapeDtypeStruct((R, W), jnp.float32),
        grid=(R // tr,),
        in_specs=[pl.BlockSpec((tr, 2 * W), lambda i: (i, 0))],
        out_specs=pl.BlockSpec((tr, W), lambda i: (i, 0)),
        compiler_params=pltpu.CompilerParams(dimension_semantics=("parallel",)),
    )(xr)
    return out[:, 0::2].reshape(C, N, H // 2, W // 2)


# -------------------- bilinear 2x upsample + fused skip add ----------------

def _upsample_add_kernel(x_ref, skip_ref, v_ref, u_ref, o_ref):
    t = jnp.dot(x_ref[...], u_ref[...], preferred_element_type=jnp.float32)
    y = jnp.dot(v_ref[...], t, preferred_element_type=jnp.float32)
    o_ref[...] = y + skip_ref[...]


def _upsample_matrix(n):
    """(n, 2n) column operator for 2x bilinear, align_corners=False."""
    u = np.zeros((n, 2 * n), np.float32)
    for j in range(n):
        u[j, 2 * j] += 0.75
        u[max(j - 1, 0), 2 * j] += 0.25
        u[j, 2 * j + 1] += 0.75
        u[min(j + 1, n - 1), 2 * j + 1] += 0.25
    return u


def upsample2x_add(x, skip):
    """skip + bilinear_upsample_2x(x).  x: (C,N,H,W), skip: (C,N,2H,2W)."""
    C, N, H, W = x.shape
    B = C * N
    m = _images_per_block(B, H)
    u = jnp.asarray(_upsample_matrix(W))                                  # (W, 2W)
    v = jnp.asarray(np.kron(np.eye(m, dtype=np.float32),
                            _upsample_matrix(H).T))                       # (2Hm, Hm)
    xr = x.reshape(B * H, W)
    sk = skip.reshape(B * 2 * H, 2 * W)
    out = pl.pallas_call(
        _upsample_add_kernel,
        out_shape=jax.ShapeDtypeStruct((B * 2 * H, 2 * W), jnp.float32),
        grid=(B // m,),
        in_specs=[pl.BlockSpec((m * H, W), lambda i: (i, 0)),
                  pl.BlockSpec((m * 2 * H, 2 * W), lambda i: (i, 0)),
                  pl.BlockSpec((m * 2 * H, m * H), lambda i: (0, 0)),
                  pl.BlockSpec((W, 2 * W), lambda i: (0, 0))],
        out_specs=pl.BlockSpec((m * 2 * H, 2 * W), lambda i: (i, 0)),
        compiler_params=pltpu.CompilerParams(dimension_semantics=("parallel",)),
    )(xr, sk, v, u)
    return out.reshape(C, N, 2 * H, 2 * W)


# ------------------------------ parameter init -----------------------------

class _Keys:
    def __init__(self, key):
        self.key = key
        self.i = 0

    def __call__(self):
        self.i += 1
        return jax.random.fold_in(self.key, self.i)


def _xavier_normal(key, shape, gain=0.02):
    fan_out = shape[0] * shape[2] * shape[3]
    fan_in = shape[1] * shape[2] * shape[3]
    std = gain * np.sqrt(2.0 / (fan_in + fan_out))
    return (std * jax.random.normal(key, shape, jnp.float32)).astype(jnp.float32)


def _pack_conv_weight(w):
    """(Cout,Cin,kh,kw) -> (Cout, kh*kw*Cin) bf16 with K ordered (ky,kx,cin)."""
    cout, cin, kh, kw = w.shape
    return jnp.transpose(w, (0, 2, 3, 1)).reshape(cout, kh * kw * cin).astype(jnp.bfloat16)


def init_conv(kg, cin, cout, k):
    return {"w": _pack_conv_weight(_xavier_normal(kg(), (cout, cin, k, k))),
            "b": jnp.zeros((cout,), jnp.float32)}


def init_gn(c):
    return {"g": jnp.ones((c,), jnp.float32), "b": jnp.zeros((c,), jnp.float32)}


def init_residual(kg, cin, cout):
    p = {"bn": init_gn(cin),
         "conv1": init_conv(kg, cin, cout // 2, 3),
         "bn2": init_gn(cout // 2),
         "conv3": init_conv(kg, cout // 2, cout, 3)}
    if cin != cout:
        p["conv4"] = init_conv(kg, cin, cout, 1)
    return p


def residual_fwd(p, x):
    out = groupnorm_relu(x, p["bn"], out_dtype=jnp.bfloat16)
    out = conv2d(out, p["conv1"], k=3, pad=1)
    out = groupnorm_relu(out, p["bn2"], out_dtype=jnp.bfloat16)
    res = conv2d(x, p["conv4"], k=1) if "conv4" in p else x
    return conv2d(out, p["conv3"], k=3, pad=1, res=res)     # fused residual add


def init_hourglass(kg, n, nModules, nFeats):
    p = {"up1": [init_residual(kg, nFeats, nFeats) for _ in range(nModules)],
         "low1": [init_residual(kg, nFeats, nFeats) for _ in range(nModules)],
         "low3": [init_residual(kg, nFeats, nFeats) for _ in range(nModules)]}
    if n > 1:
        p["low2"] = init_hourglass(kg, n - 1, nModules, nFeats)
    else:
        p["low2_"] = [init_residual(kg, nFeats, nFeats) for _ in range(nModules)]
    return p


def hourglass_fwd(p, x):
    up1 = x
    for rp in p["up1"]:
        up1 = residual_fwd(rp, up1)
    low1 = maxpool2x2(x)
    for rp in p["low1"]:
        low1 = residual_fwd(rp, low1)
    if "low2" in p:
        low2 = hourglass_fwd(p["low2"], low1)
    else:
        low2 = low1
        for rp in p["low2_"]:
            low2 = residual_fwd(rp, low2)
    low3 = low2
    for rp in p["low3"]:
        low3 = residual_fwd(rp, low3)
    return upsample2x_add(low3, up1)                         # fused up1 + up2


def init_hourglass_net(key, nStack, nModules, nFeats, numOutput):
    kg = _Keys(key)
    p = {"conv1_": init_conv(kg, 3, 64, 7),
         "bn1": init_gn(64),
         "r1": init_residual(kg, 64, 128),
         "r4": init_residual(kg, 128, 128),
         "r5": init_residual(kg, 128, nFeats),
         "hourglass": [], "Residual": [], "lin_": [], "tmpOut": [],
         "ll_": [], "tmpOut_": []}
    for i in range(nStack):
        p["hourglass"].append(init_hourglass(kg, 4, nModules, nFeats))
        p["Residual"].append([init_residual(kg, nFeats, nFeats)
                              for _ in range(nModules)])
        p["lin_"].append({"conv": init_conv(kg, nFeats, nFeats, 1),
                          "gn": init_gn(nFeats)})
        p["tmpOut"].append(init_conv(kg, nFeats, numOutput, 1))
        if i < nStack - 1:
            p["ll_"].append(init_conv(kg, nFeats, nFeats, 1))
            p["tmpOut_"].append(init_conv(kg, numOutput, nFeats, 1))
    return p


def hourglass_net_fwd(p, x_nchw):
    x = jnp.transpose(x_nchw, (1, 0, 2, 3))                  # NCHW -> CNHW (once)
    x = conv2d(x, p["conv1_"], k=7, stride=2, pad=3)
    x = groupnorm_relu(x, p["bn1"])
    x = residual_fwd(p["r1"], x)
    x = maxpool2x2(x)
    x = residual_fwd(p["r4"], x)
    x = residual_fwd(p["r5"], x)
    outs = []
    n_stack = len(p["hourglass"])
    for i in range(n_stack):
        hg = hourglass_fwd(p["hourglass"][i], x)
        ll = hg
        for rp in p["Residual"][i]:
            ll = residual_fwd(rp, ll)
        ll = conv2d(ll, p["lin_"][i]["conv"], k=1)
        ll = groupnorm_relu(ll, p["lin_"][i]["gn"], out_dtype=jnp.bfloat16)
        tmp = conv2d(ll, p["tmpOut"][i], k=1)
        outs.append(jnp.transpose(tmp, (1, 0, 2, 3)))        # back to NCHW
        if i < n_stack - 1:
            xa = conv2d(ll, p["ll_"][i], k=1, res=x)         # x + ll_   (fused)
            x = conv2d(tmp, p["tmpOut_"][i], k=1, res=xa)    # + tmpOut_ (fused)
    return outs


# --------------------------------- checks ----------------------------------

def _upsample_ref(x):
    C, N, H, W = x.shape
    xp = jnp.concatenate([x[:, :, :1, :], x[:, :, :-1, :]], axis=2)
    xn = jnp.concatenate([x[:, :, 1:, :], x[:, :, -1:, :]], axis=2)
    even = 0.25 * xp + 0.75 * x
    odd = 0.75 * x + 0.25 * xn
    xh = jnp.stack([even, odd], axis=3).reshape(C, N, 2 * H, W)
    xp2 = jnp.concatenate([xh[:, :, :, :1], xh[:, :, :, :-1]], axis=3)
    xn2 = jnp.concatenate([xh[:, :, :, 1:], xh[:, :, :, -1:]], axis=3)
    even2 = 0.25 * xp2 + 0.75 * xh
    odd2 = 0.75 * xh + 0.25 * xn2
    return jnp.stack([even2, odd2], axis=4).reshape(C, N, 2 * H, 2 * W)


def _self_check():
    key = jax.random.PRNGKey(1)

    # conv 3x3 (bf16 GEMM, f32 accumulation) vs lax.conv on bf16-rounded inputs
    x = jax.random.normal(jax.random.fold_in(key, 1), (4, 2, 8, 8), jnp.float32)
    w = 0.1 * jax.random.normal(jax.random.fold_in(key, 2), (8, 4, 3, 3), jnp.float32)
    b = 0.1 * jax.random.normal(jax.random.fold_in(key, 3), (8,), jnp.float32)
    y = conv2d(x, {"w": _pack_conv_weight(w), "b": b}, k=3, pad=1)
    xr = x.astype(jnp.bfloat16).astype(jnp.float32)
    wr = w.astype(jnp.bfloat16).astype(jnp.float32)
    ref = jax.lax.conv_general_dilated(
        jnp.transpose(xr, (1, 0, 2, 3)), wr, (1, 1), ((1, 1), (1, 1)),
        dimension_numbers=("NCHW", "OIHW", "NCHW"),
        precision=jax.lax.Precision.HIGHEST) + b.reshape(1, -1, 1, 1)
    np.testing.assert_allclose(np.asarray(jnp.transpose(y, (1, 0, 2, 3))),
                               np.asarray(ref), rtol=2e-2, atol=2e-3)

    # 1x1 conv with fused residual add
    w1 = 0.1 * jax.random.normal(jax.random.fold_in(key, 4), (8, 4, 1, 1), jnp.float32)
    resid = jax.random.normal(jax.random.fold_in(key, 5), (8, 2, 8, 8), jnp.float32)
    y1 = conv2d(x, {"w": _pack_conv_weight(w1), "b": jnp.zeros((8,), jnp.float32)},
                k=1, res=resid)
    w1r = w1.astype(jnp.bfloat16).astype(jnp.float32)
    ref1 = jax.lax.conv_general_dilated(
        jnp.transpose(xr, (1, 0, 2, 3)), w1r, (1, 1), ((0, 0), (0, 0)),
        dimension_numbers=("NCHW", "OIHW", "NCHW"),
        precision=jax.lax.Precision.HIGHEST) + jnp.transpose(resid, (1, 0, 2, 3))
    np.testing.assert_allclose(np.asarray(jnp.transpose(y1, (1, 0, 2, 3))),
                               np.asarray(ref1), rtol=2e-2, atol=2e-3)

    # GroupNorm + ReLU
    xg = jax.random.normal(jax.random.fold_in(key, 6), (8, 2, 4, 4), jnp.float32)
    gg = 1.0 + 0.1 * jax.random.normal(jax.random.fold_in(key, 7), (8,), jnp.float32)
    gb = 0.1 * jax.random.normal(jax.random.fold_in(key, 8), (8,), jnp.float32)
    got = groupnorm_relu(xg, {"g": gg, "b": gb})
    xr5 = xg.reshape(4, 2, 2, 16)
    mean = xr5.mean(axis=(1, 3), keepdims=True)
    var = ((xr5 - mean) ** 2).mean(axis=(1, 3), keepdims=True)
    refg = (xr5 - mean) / jnp.sqrt(var + 1e-5) * gg.reshape(4, 2, 1, 1) \
        + gb.reshape(4, 2, 1, 1)
    refg = jnp.maximum(refg, 0.0).reshape(8, 2, 4, 4)
    np.testing.assert_allclose(np.asarray(got), np.asarray(refg),
                               rtol=1e-3, atol=1e-4)

    # 2x2 max-pool
    xm = jax.random.normal(jax.random.fold_in(key, 9), (16, 2, 8, 8), jnp.float32)
    refm = xm.reshape(16, 2, 4, 2, 4, 2).max(axis=(3, 5))
    np.testing.assert_allclose(np.asarray(maxpool2x2(xm)), np.asarray(refm),
                               rtol=0, atol=1e-6)

    # bilinear 2x upsample + fused skip add
    xu = jax.random.normal(jax.random.fold_in(key, 10), (16, 2, 8, 8), jnp.float32)
    su = jax.random.normal(jax.random.fold_in(key, 11), (16, 2, 16, 16), jnp.float32)
    refu = _upsample_ref(xu) + su
    np.testing.assert_allclose(np.asarray(upsample2x_add(xu, su)), np.asarray(refu),
                               rtol=2e-2, atol=2e-3)


# ---------------------------------- main -----------------------------------

if __name__ == "__main__":
    NSTACK, NMODULES, NFEATS, NUMOUT = 2, 1, 16, 8
    BATCH, HIN, WIN = 2, 64, 64   # hourglass depth 4 needs >= 64 input spatial

    _self_check()

    params = init_hourglass_net(jax.random.PRNGKey(0),
                                NSTACK, NMODULES, NFEATS, NUMOUT)
    x = jax.random.normal(jax.random.PRNGKey(0), (BATCH, 3, HIN, WIN), jnp.float32)

    fwd = jax.jit(hourglass_net_fwd)
    outs = fwd(params, x)
    jax.block_until_ready(outs)

    assert len(outs) == NSTACK
    assert all(o.shape == (BATCH, NUMOUT, HIN // 4, WIN // 4) for o in outs)
    assert all(bool(jnp.all(jnp.isfinite(o))) for o in outs)
    print("KERNEL_OK")
</pallas_src>

<mosaic_0001>
module attributes {stable_mosaic.version = 11 : i64} {
  func.func @_gemm_bias_kernel(%arg0: i32, %arg1: memref<8x36xbf16, #tpu.memory_space<vmem>>, %arg2: memref<36x128xbf16, #tpu.memory_space<vmem>>, %arg3: memref<8x1xf32, #tpu.memory_space<vmem>>, %arg4: memref<8x128xf32, #tpu.memory_space<vmem>>) attributes {dimension_semantics = [#tpu.dimension_semantics<parallel>], iteration_bounds = array<i64: 1>, scalar_prefetch = 0 : i64, scratch_operands = 0 : i64, tpu.core_type = #tpu.core_type<tc>, window_params = [{pipeline_mode = #tpu.pipeline_mode<synchronous>, transform_indices = @transform_0, window_bounds = array<i64: 8, 36>}, {transform_indices = @transform_1, window_bounds = array<i64: 36, 128>}, {pipeline_mode = #tpu.pipeline_mode<synchronous>, transform_indices = @transform_2, window_bounds = array<i64: 8, 1>}, {transform_indices = @transform_3, window_bounds = array<i64: 8, 128>}]} {
    %c0 = arith.constant 0 : index
    %c0_0 = arith.constant 0 : index
    %0 = vector.load %arg1[%c0, %c0_0] : memref<8x36xbf16, #tpu.memory_space<vmem>>, vector<8x36xbf16>
    %c0_1 = arith.constant 0 : index
    %c0_2 = arith.constant 0 : index
    %1 = vector.load %arg2[%c0_1, %c0_2] : memref<36x128xbf16, #tpu.memory_space<vmem>>, vector<36x128xbf16>
    %cst = arith.constant dense<0.000000e+00> : vector<8x128xf32>
    %2 = tpu.matmul %0, %1, %cst {dimension_numbers = #tpu.dot_dimension_numbers<[1], [0], [0], [1], [0, 0, 1, 1], [], []>} : vector<8x36xbf16>, vector<36x128xbf16>, vector<8x128xf32> -> vector<8x128xf32>
    %c0_3 = arith.constant 0 : index
    %c0_4 = arith.constant 0 : index
    %3 = vector.load %arg3[%c0_3, %c0_4] : memref<8x1xf32, #tpu.memory_space<vmem>>, vector<8x1xf32>
    %4 = vector.broadcast %3 : vector<8x1xf32> to vector<8x128xf32>
    %5 = arith.addf %2, %4 : vector<8x128xf32>
    %c0_5 = arith.constant 0 : index
    %c0_6 = arith.constant 0 : index
    %6 = vector.load %arg4[%c0_5, %c0_6] : memref<8x128xf32, #tpu.memory_space<vmem>>, vector<8x128xf32>
    tpu.vector_store %arg4[%c0_5, %c0_6], %5 {strides = array<i32>} : memref<8x128xf32, #tpu.memory_space<vmem>>, vector<8x128xf32>,
    return
  }
  func.func @transform_0(%arg0: i32) -> (i32, i32) {
    %c0_i32 = arith.constant 0 : i32
    %c0_i32_0 = arith.constant 0 : i32
    %c0_i32_1 = arith.constant 0 : i32
    return %c0_i32, %c0_i32_0 : i32, i32
  }
  func.func @transform_1(%arg0: i32) -> (i32, i32) {
    %c0_i32 = arith.constant 0 : i32
    %c0_i32_0 = arith.constant 0 : i32
    return %c0_i32, %arg0 : i32, i32
  }
  func.func @transform_2(%arg0: i32) -> (i32, i32) {
    %c0_i32 = arith.constant 0 : i32
    %c0_i32_0 = arith.constant 0 : i32
    %c0_i32_1 = arith.constant 0 : i32
    return %c0_i32, %c0_i32_0 : i32, i32
  }
  func.func @transform_3(%arg0: i32) -> (i32, i32) {
    %c0_i32 = arith.constant 0 : i32
    %c0_i32_0 = arith.constant 0 : i32
    return %c0_i32, %arg0 : i32, i32
  }
}

</mosaic_0001>

<bundles_post_ra>
// kernel: tpu_custom_call.1
= control target key start
LH: loop header
LB: loop body
LE: loop exit
PB: predicated region body
PF: predicated region fallthrough
CT: control target
= control target key end

     0   :  { %8 = vsyncpa [#allocation3], 0  ;;  %s255_s0 = inlined_call_operand.vmem [shape: bf16[8,36], index: 0, kind: input, shape index: {}]   ;;  %s256_s1 = inlined_call_operand.hbm [shape: bf16[36,128], index: 1, kind: input, shape index: {}]   ;;  %s257_s2 = inlined_call_operand.vmem [shape: f32[8,1], index: 2, kind: input, shape index: {}]   ;;  %s258_s3 = inlined_call_operand.hbm [shape: f32[8,128], index: 3, kind: output, shape index: {}]  }
   0x1   :  { %9 = vsyncpa [#allocation4], 0  ;;  %s198_s12 = smov [#allocation2]   ;;  %s150_s16 = scalar_lea.hbm %s256_s1, 320 }
   0x2   :  { %s17_s13 = sshll.u32 %s198_s12, 4  ;;  %p151_p0 = scmp.ne.s32.totalorder %s256_s1, %s150_s16  ;;  %s18_s13 = int_to_ptr.vmem [resolvable:$true] %s17_s13 }
   0x3   :  { %p154_p1 = scmp.lt.u32.totalorder %s150_s16, %s256_s1 }
   0x5   :  { %p156_p2 = pnand %p154_p1, %p151_p0 }
   0x7   :  { %159 = shalt.err (!%p156_p2)
}
   0x8   :  { %s160_s21 = scalar_lea.vmem %s18_s13, 320  ;;  %p165_p4 = scmp.lt.s32.totalorder %s18_s13, %s18_s13 }
   0x9   :  { %p161_p3 = scmp.ne.s32.totalorder %s18_s13, %s160_s21  ;;  %p166_p5 = scmp.lt.s32.totalorder %s160_s21, %s160_s21 }
   0xb   :  { %p167_p6 = por %p166_p5, %p165_p4 }
   0xd   :  { %p168_p7 = pnand %p167_p6, %p161_p3 }
   0xf   :  { %171 = shalt.err (!%p168_p7)
}
  0x10   :  { %s199_s22 = smov 64   ;;  %s200_s23 = smov 4  }
  0x11   :  { %23 = dma.hbm_to_vmem [thread:$0]  %s256_s1, 320, %s18_s13, [#allocation3], %s199_s22, %s199_s22, %s200_s23  }
  0x12   :  { %194 = dma.done.wait [#allocation3], 320  }
  0x13   :  { %195 = vsyncadd [#allocation3], 4294966976  ;;  %v201_v0 = vmov 0.0   ;;  %vm202_vm0 = vmmov 0   ;;  %v203_v1 = vmov 0   ;;  %v147_v2 = vld [vmem:[#allocation2] sm:$0xff]  }
  0x14   :  { %129 = vmatprep.subr.bf16.mxu0 %v201_v0  ;;  %135 = vmatprep.mubr.msk.bf16.mxu0 %vm202_vm0, %v201_v0  ;;  %v148_v3 = vld [vmem:[#allocation2 + $0x8] sm:$0xff]   ;;  %v36_v4 = vld [vmem:[%s257_s2] sm:$0xff]  ;;  %v149_v5 = vld [vmem:[#allocation2 + $0x10] ss:$0 sps:$4 sm:$0x33]   ;;  %vm61_vm1 = vcmask 1041408  }
  0x15   :  { %146 = vset.pattern.permute.xlu0 %v203_v1  ;;  %130 = vmatpush3.bf16.msra.mxu0 %v147_v2  ;;  %v63_v6 = vsel %vm61_vm1, %v149_v5, 0  ;;  %v30_v7 = vld [vmem:[%s255_s0] sm:$0xf]  ;;  %vm57_vm2 = vcmask 293888   ;;  %s204_s29 = smov [#allocation5]  }
  0x16   :  { %131 = vmatprep.subr.bf16.mxu0 %v201_v0  ;;  %39 = vperm.xlu0 %146, %v36_v4   ;;  %s112_s30 = sshll.u32 %s204_s29, 4  ;;  %s113_s30 = int_to_ptr.vmem [resolvable:$true] %s112_s30 }
  0x17   :  { %s172_s2 = scalar_lea.vmem %s113_s30, 128  ;;  %p177_p9 = scmp.lt.s32.totalorder %s113_s30, %s113_s30 }
  0x18   :  { %p173_p8 = scmp.ne.s32.totalorder %s113_s30, %s172_s2  ;;  %p178_p10 = scmp.lt.s32.totalorder %s172_s2, %s172_s2 }
  0x19   :  { %132 = vmatpush3.bf16.msra.mxu0 %v148_v3 }
  0x1a   :  { %133 = vmatprep.subr.bf16.mxu0 %v201_v0  ;;  %p179_p11 = por %p178_p10, %p177_p9 }
  0x1c   :  { %p180_p12 = pnand %p179_p11, %p173_p8 }
  0x1d   :  { %134 = vmatpush3.bf16.msra.mxu0 %v63_v6 }
  0x20   :  { %136 = vmatmul.mubr.msk.bf16.vlgmr.msra.gmra.mrb[0].mxu0 %vm57_vm2, %v30_v7 }
  0x95   :  { %v40_v8 = vpop.permute.xlu0 %39 }
  0xf3   :  { %v99_v9 = vpop.f32.mrb[0].mxu0 }
  0xf4   :  { %v100_v10 = vadd.f32 %v99_v9, %v40_v8  ;;  %v137_v11 = vpop.f32.mrb[1].mxu0 }
  0xf5   :  { %v102_v12 = vpop.f32.mrb[2].mxu0 }
  0xf6   :  { %105 = vst [vmem:[#allocation5] sm:$0xff] %v100_v10  ;;  %v138_v13 = vpop.f32.mrb[3].mxu0 }
  0xf7   :  { %183 = shalt.err (!%p180_p12)
}
  0xf8   :  { %s184_s5 = scalar_lea.hbm %s258_s3, 128 }
  0xf9   :  { %p185_p13 = scmp.ne.s32.totalorder %s258_s3, %s184_s5  ;;  %p188_p0 = scmp.lt.u32.totalorder %s184_s5, %s258_s3 }
  0xfb   :  { %p190_p1 = pnand %p188_p0, %p185_p13 }
  0xfd   :  { %193 = shalt.err (!%p190_p1)
}
  0xfe   :  { %115 = dma.vmem_to_hbm [thread:$0]  %s113_s30, 128, %s258_s3, [#allocation4]  }
  0xff   :  { %196 = dma.done.wait [#allocation4], 128  }
 0x100   :  { %197 = vsyncadd [#allocation4], 4294967168 }
 0x101   :  { %119 = vsyncpa [#allocation3], 1 }
 0x102   :  { %120 = vsyncpa [#allocation4], 1 }

</bundles_post_ra>
